<compile_context>
chip_gen: v5e
topology: v5e:2x2
jax: 0.10.0
libtpu: 0.0.40
codegen_flags: <defaults>
</compile_context>

<pallas_src>
import functools

import jax
import jax.numpy as jnp
from jax.experimental import pallas as pl
from jax.experimental.pallas import tpu as pltpu


def _cdiv(a, b):
    return -(-a // b)


def _round_up(n, m):
    return _cdiv(n, m) * m


def _fused_sampler_kernel(y_ref, x_ref, wx_ref, we_ref, out_ref, *, embed_dim):
    """out = [x | one_hot(y) | 1] @ W_aug, computed as two MXU pushes.

    One-hot / constant-1 assembly happens in-register (iota == y), so there is
    no XLA glue and no HBM round trip of an augmented LHS.
    NOTE: out-of-range y gives an all-zero one-hot row (embed = bias only),
    like jax.nn.one_hot; PyTorch's F.one_hot would raise instead.
    """
    x = x_ref[...]                                     # (tm, in_dim) f32
    y = y_ref[...]                                     # (tm, 1)      i32
    tm = x.shape[0]
    k_e = we_ref.shape[0]                              # round_up(embed_dim+1, 8)

    # cols [0, embed_dim): one_hot(y); col embed_dim: constant 1 (bias row);
    # cols > embed_dim: zeros (matching zero rows of we_ref).
    col = jax.lax.broadcasted_iota(jnp.int32, (tm, k_e), 1)
    oh1 = jnp.where((col == y) | (col == embed_dim), 1.0, 0.0)   # (tm, k_e)

    acc = jnp.dot(x, wx_ref[...], preferred_element_type=jnp.float32)
    acc = acc + jnp.dot(oh1, we_ref[...], preferred_element_type=jnp.float32)
    out_ref[...] = acc.astype(out_ref.dtype)


def fuse_params(params, in_dim, latent_dim, embed_dim):
    """Build the fused weight blocks ONCE (outside the per-call path).

    wx: [in_dim, n_pad]           cols [0,L)/[L,2L) = logvar/mean weights.
    we: [round8(embed+1), n_pad]  rows [0,embed) cols [2L,3L) = embed weights,
                                  row embed = all three biases, rest zero.
    n_pad >= 128 so the output store is lane-dense.
    """
    L = latent_dim
    n_pad = max(128, _round_up(3 * L, 128))

    wx = jnp.zeros((in_dim, n_pad), jnp.float32)
    wx = wx.at[:, 0:L].set(params["w_logvar"].T)
    wx = wx.at[:, L:2 * L].set(params["w_mean"].T)

    k_e = _round_up(embed_dim + 1, 8)
    we = jnp.zeros((k_e, n_pad), jnp.float32)
    we = we.at[:embed_dim, 2 * L:3 * L].set(params["w_embed"].T)
    we = we.at[embed_dim, 0:L].set(params["b_logvar"])
    we = we.at[embed_dim, L:2 * L].set(params["b_mean"])
    we = we.at[embed_dim, 2 * L:3 * L].set(params["b_embed"])
    return wx, we


def _pick_tile(B, *, tm_max=1024, min_split=512):
    """Row-tile size and grid length.

    B <= min_split : single full-array block (latency bound; extra grid steps
                     only add the ~0.35us/step overhead).
    B >  min_split : at least 2 blocks of <= tm_max rows (8-row aligned) so
                     the parallel grid axis shards across v7x's two
                     TensorCores and padding waste stays < 8 rows per step.
    """
    if B <= min_split:
        return B, 1
    n_steps = max(2, _cdiv(B, tm_max))
    tm = _round_up(_cdiv(B, n_steps), 8)
    return tm, _cdiv(B, tm)


@functools.partial(jax.jit, static_argnums=(4, 5))
def sampler_forward(x, y, wx, we, latent_dim, embed_dim):
    """x: [B, in_dim] f32, y: [B] int, (wx, we) from fuse_params.

    Returns (logvar, mean, embed), each [B, latent_dim] f32.
    """
    B, in_dim = x.shape
    k_e, n_pad = we.shape
    L = latent_dim

    y2 = y.reshape(B, 1).astype(jnp.int32)           # metadata-only reshape

    tm, grid = _pick_tile(B)

    kernel = functools.partial(_fused_sampler_kernel, embed_dim=embed_dim)
    cost = pl.CostEstimate(
        flops=2 * B * (in_dim + k_e) * n_pad,
        transcendentals=0,
        bytes_accessed=4 * (B * in_dim + B + in_dim * n_pad
                            + k_e * n_pad + B * n_pad),
    )

    out = pl.pallas_call(
        kernel,
        out_shape=jax.ShapeDtypeStruct((B, n_pad), jnp.float32),
        grid=(grid,),
        in_specs=[
            pl.BlockSpec((tm, 1), lambda i: (i, 0)),         # y row tile
            pl.BlockSpec((tm, in_dim), lambda i: (i, 0)),    # x row tile
            pl.BlockSpec((in_dim, n_pad), lambda i: (0, 0)),  # resident weight
            pl.BlockSpec((k_e, n_pad), lambda i: (0, 0)),     # resident weight+bias
        ],
        out_specs=pl.BlockSpec((tm, n_pad), lambda i: (i, 0)),
        compiler_params=pltpu.CompilerParams(
            dimension_semantics=("parallel",)),
        cost_estimate=cost,
    )(y2, x, wx, we)

    # Useful columns are [0, 3L); the 128-lane padding is never read back.
    return out[:, 0:L], out[:, L:2 * L], out[:, 2 * L:3 * L]


def init_params(key, in_dim, latent_dim, embed_dim):
    """Deterministic init mimicking nn.Linear's uniform(-1/sqrt(fan_in), .)."""
    ks = jax.random.split(key, 6)

    def lin(kw, kb, fan_in, fan_out):
        bound = 1.0 / jnp.sqrt(fan_in)
        w = jax.random.uniform(kw, (fan_out, fan_in), jnp.float32, -bound, bound)
        b = jax.random.uniform(kb, (fan_out,), jnp.float32, -bound, bound)
        return w, b

    w_lv, b_lv = lin(ks[0], ks[1], in_dim, latent_dim)
    w_m, b_m = lin(ks[2], ks[3], in_dim, latent_dim)
    w_e, b_e = lin(ks[4], ks[5], embed_dim, latent_dim)
    return {
        "w_logvar": w_lv, "b_logvar": b_lv,
        "w_mean": w_m, "b_mean": b_m,
        "w_embed": w_e, "b_embed": b_e,
    }


def _reference(params, x, y, embed_dim):
    hp = jax.lax.Precision.HIGHEST
    lv = jnp.dot(x, params["w_logvar"].T, precision=hp) + params["b_logvar"]
    mn = jnp.dot(x, params["w_mean"].T, precision=hp) + params["b_mean"]
    em = (jnp.dot(jax.nn.one_hot(y, embed_dim, dtype=jnp.float32),
                  params["w_embed"].T, precision=hp) + params["b_embed"])
    return lv, mn, em


if __name__ == "__main__":
    in_dim, latent_dim, embed_dim = 32, 16, 10

    key = jax.random.PRNGKey(0)
    kx, ky, kp, kx2, ky2 = jax.random.split(key, 5)
    params = init_params(kp, in_dim, latent_dim, embed_dim)
    wx, we = fuse_params(params, in_dim, latent_dim, embed_dim)   # fuse once

    # --- small batch (grid=(1,), latency-bound path) ---
    B = 8
    x = jax.random.normal(kx, (B, in_dim), dtype=jnp.float32)
    y = jax.random.randint(ky, (B,), 0, embed_dim, dtype=jnp.int32)
    logvar, mean, embed = sampler_forward(x, y, wx, we, latent_dim, embed_dim)
    jax.block_until_ready((logvar, mean, embed))

    r_lv, r_mn, r_em = _reference(params, x, y, embed_dim)
    assert logvar.shape == (B, latent_dim)
    assert mean.shape == (B, latent_dim)
    assert embed.shape == (B, latent_dim)
    assert jnp.allclose(logvar, r_lv, atol=2e-5)
    assert jnp.allclose(mean, r_mn, atol=2e-5)
    assert jnp.allclose(embed, r_em, atol=2e-5)

    # --- larger batch (tiled path, partial boundary block, TC sharding) ---
    B2 = 600
    x2 = jax.random.normal(kx2, (B2, in_dim), dtype=jnp.float32)
    y2 = jax.random.randint(ky2, (B2,), 0, embed_dim, dtype=jnp.int32)
    lv2, mn2, em2 = sampler_forward(x2, y2, wx, we, latent_dim, embed_dim)
    jax.block_until_ready((lv2, mn2, em2))

    r_lv2, r_mn2, r_em2 = _reference(params, x2, y2, embed_dim)
    assert jnp.allclose(lv2, r_lv2, atol=2e-5)
    assert jnp.allclose(mn2, r_mn2, atol=2e-5)
    assert jnp.allclose(em2, r_em2, atol=2e-5)

    print("KERNEL_OK")
</pallas_src>

<mosaic_0001>
module attributes {stable_mosaic.version = 11 : i64} {
  func.func @_fused_sampler_kernel(%arg0: i32, %arg1: memref<8x1xi32, #tpu.memory_space<vmem>>, %arg2: memref<8x32xf32, #tpu.memory_space<vmem>>, %arg3: memref<32x128xf32, #tpu.memory_space<vmem>>, %arg4: memref<16x128xf32, #tpu.memory_space<vmem>>, %arg5: memref<8x128xf32, #tpu.memory_space<vmem>>) attributes {dimension_semantics = [#tpu.dimension_semantics<parallel>], iteration_bounds = array<i64: 1>, scalar_prefetch = 0 : i64, scratch_operands = 0 : i64, tpu.core_type = #tpu.core_type<tc>, window_params = [{transform_indices = @transform_0, window_bounds = array<i64: 8, 1>}, {transform_indices = @transform_1, window_bounds = array<i64: 8, 32>}, {pipeline_mode = #tpu.pipeline_mode<synchronous>, transform_indices = @transform_2, window_bounds = array<i64: 32, 128>}, {pipeline_mode = #tpu.pipeline_mode<synchronous>, transform_indices = @transform_3, window_bounds = array<i64: 16, 128>}, {transform_indices = @transform_4, window_bounds = array<i64: 8, 128>}]} {
    %c0 = arith.constant 0 : index
    %c0_0 = arith.constant 0 : index
    %0 = vector.load %arg2[%c0, %c0_0] : memref<8x32xf32, #tpu.memory_space<vmem>>, vector<8x32xf32>
    %c0_1 = arith.constant 0 : index
    %c0_2 = arith.constant 0 : index
    %1 = vector.load %arg1[%c0_1, %c0_2] : memref<8x1xi32, #tpu.memory_space<vmem>>, vector<8x1xi32>
    %2 = tpu.iota {dimensions = array<i32: 1>} : vector<8x16xi32>
    %3 = vector.broadcast %1 : vector<8x1xi32> to vector<8x16xi32>
    %4 = arith.cmpi eq, %2, %3 : vector<8x16xi32>
    %c10_i32 = arith.constant 10 : i32
    %5 = vector.broadcast %c10_i32 : i32 to vector<8x16xi32>
    %6 = arith.cmpi eq, %2, %5 : vector<8x16xi32>
    %7 = arith.ori %4, %6 : vector<8x16xi1>
    %cst = arith.constant 1.000000e+00 : f32
    %cst_3 = arith.constant 0.000000e+00 : f32
    %8 = vector.broadcast %cst : f32 to vector<8x16xf32>
    %9 = vector.broadcast %cst_3 : f32 to vector<8x16xf32>
    %10 = arith.select %7, %8, %9 : vector<8x16xi1>, vector<8x16xf32>
    %c0_4 = arith.constant 0 : index
    %c0_5 = arith.constant 0 : index
    %11 = vector.load %arg3[%c0_4, %c0_5] : memref<32x128xf32, #tpu.memory_space<vmem>>, vector<32x128xf32>
    %cst_6 = arith.constant dense<0.000000e+00> : vector<8x128xf32>
    %12 = tpu.matmul %0, %11, %cst_6 {dimension_numbers = #tpu.dot_dimension_numbers<[1], [0], [0], [1], [0, 0, 1, 1], [], []>} : vector<8x32xf32>, vector<32x128xf32>, vector<8x128xf32> -> vector<8x128xf32>
    %c0_7 = arith.constant 0 : index
    %c0_8 = arith.constant 0 : index
    %13 = vector.load %arg4[%c0_7, %c0_8] : memref<16x128xf32, #tpu.memory_space<vmem>>, vector<16x128xf32>
    %cst_9 = arith.constant dense<0.000000e+00> : vector<8x128xf32>
    %14 = tpu.matmul %10, %13, %cst_9 {dimension_numbers = #tpu.dot_dimension_numbers<[1], [0], [0], [1], [0, 0, 1, 1], [], []>} : vector<8x16xf32>, vector<16x128xf32>, vector<8x128xf32> -> vector<8x128xf32>
    %15 = arith.addf %12, %14 : vector<8x128xf32>
    %c0_10 = arith.constant 0 : index
    %c0_11 = arith.constant 0 : index
    %16 = vector.load %arg5[%c0_10, %c0_11] : memref<8x128xf32, #tpu.memory_space<vmem>>, vector<8x128xf32>
    tpu.vector_store %arg5[%c0_10, %c0_11], %15 {strides = array<i32>} : memref<8x128xf32, #tpu.memory_space<vmem>>, vector<8x128xf32>,
    return
  }
  func.func @transform_0(%arg0: i32) -> (i32, i32) {
    %c0_i32 = arith.constant 0 : i32
    %c0_i32_0 = arith.constant 0 : i32
    return %arg0, %c0_i32 : i32, i32
  }
  func.func @transform_1(%arg0: i32) -> (i32, i32) {
    %c0_i32 = arith.constant 0 : i32
    %c0_i32_0 = arith.constant 0 : i32
    return %arg0, %c0_i32 : i32, i32
  }
  func.func @transform_2(%arg0: i32) -> (i32, i32) {
    %c0_i32 = arith.constant 0 : i32
    %c0_i32_0 = arith.constant 0 : i32
    %c0_i32_1 = arith.constant 0 : i32
    return %c0_i32, %c0_i32_0 : i32, i32
  }
  func.func @transform_3(%arg0: i32) -> (i32, i32) {
    %c0_i32 = arith.constant 0 : i32
    %c0_i32_0 = arith.constant 0 : i32
    %c0_i32_1 = arith.constant 0 : i32
    return %c0_i32, %c0_i32_0 : i32, i32
  }
  func.func @transform_4(%arg0: i32) -> (i32, i32) {
    %c0_i32 = arith.constant 0 : i32
    %c0_i32_0 = arith.constant 0 : i32
    return %arg0, %c0_i32 : i32, i32
  }
}

</mosaic_0001>

<bundles_post_ra>
// kernel: sampler_forward.1
= control target key start
LH: loop header
LB: loop body
LE: loop exit
PB: predicated region body
PF: predicated region fallthrough
CT: control target
= control target key end

     0   :  { %9 = vsyncpa [#allocation3], 0  ;;  %s228_s0 = inlined_call_operand.vmem [shape: s32[8,1], index: 0, kind: input, shape index: {}]   ;;  %s229_s1 = inlined_call_operand.vmem [shape: f32[8,32], index: 1, kind: input, shape index: {}]   ;;  %s230_s2 = inlined_call_operand.hbm [shape: f32[32,128], index: 2, kind: input, shape index: {}]   ;;  %s231_s3 = inlined_call_operand.hbm [shape: f32[16,128], index: 3, kind: input, shape index: {}]   ;;  %s232_s4 = inlined_call_operand.vmem [shape: f32[8,128], index: 4, kind: output, shape index: {}]  }
   0x1   :  { %s19_s17 = sshll.u32 %s230_s2, 4  ;;  %s20_s17 = int_to_ptr.hbm [resolvable:$true] %s19_s17 }
   0x2   :  { %10 = vsyncpa [#allocation5], 0  ;;  %s182_s18 = smov [#allocation2]   ;;  %s32_s22 = sshll.u32 %s231_s3, 4  ;;  %s33_s22 = int_to_ptr.hbm [resolvable:$true] %s32_s22 }
   0x3   :  { %s21_s19 = sshll.u32 %s182_s18, 4  ;;  %s183_s23 = smov 128   ;;  %s22_s19 = int_to_ptr.vmem [resolvable:$true] %s21_s19 }
   0x4   :  { %s184_s24 = smov 8   ;;  %s185_s25 = smov [#allocation4]  }
   0x5   :  { %27 = dma.hbm_to_vmem [thread:$0]  %s20_s17, 512, %s22_s19, [#allocation3], %s183_s23, %s183_s23, %s184_s24  }
   0x6   :  { %s34_s26 = sshll.u32 %s185_s25, 4  ;;  %s35_s26 = int_to_ptr.vmem [resolvable:$true] %s34_s26 }
   0x7   :  { %40 = dma.hbm_to_vmem [thread:$0]  %s33_s22, 256, %s35_s26, [#allocation5], %s183_s23, %s183_s23, %s184_s24  }
   0x8   :  { %178 = dma.done.wait [#allocation3], 512  }
   0x9   :  { %179 = vsyncadd [#allocation3], 4294966784 }
   0xa   :  { %180 = dma.done.wait [#allocation5], 256  }
   0xb   :  { %181 = vsyncadd [#allocation5], 4294967040  ;;  %v186_v0 = vmov 0   ;;  %v50_v1 = vld [vmem:[%s228_s0] sm:$0xff]  ;;  %v63_v2 = vld [vmem:[#allocation2 + $0x18] sm:$0xff]  ;;  %vm90_vm0 = vcmask 261120   ;;  %v51_v9 = vlaneseq }
   0xc   :  { %129 = vset.pattern.permute.xlu0 %v186_v0  ;;  %v62_v3 = vld [vmem:[#allocation2 + $0x10] sm:$0xff]  ;;  %106 = vmatpush.msra.mxu1 %v63_v2  ;;  %v65_v4 = vld [vmem:[#allocation4 + $0x8] sm:$0xff]  ;;  %v64_v6 = vld [vmem:[#allocation4] sm:$0xff]  ;;  %vm66_vm3 = vcmask 130048   ;;  %v187_v12 = vmov 0.0  }
   0xd   :  { %54 = vperm.xlu0 %129, %v50_v1   ;;  %v61_v5 = vld [vmem:[#allocation2 + $0x8] sm:$0xff]  ;;  %84 = vmatpush.msra.mxu0 %v65_v4  ;;  %v60_v7 = vld [vmem:[#allocation2] sm:$0xff]  ;;  %v52_v10 = vand.u32 127, %v51_v9 }
   0xe   :  { %107 = vmatpush.msra.mxu1 %v62_v3  ;;  %v49_v8 = vld [vmem:[%s229_s1] sm:$0xff] }
   0xf   :  { %85 = vmatpush.msra.mxu0 %v64_v6  ;;  %vm57_vm1 = vcmp.eq.s32.totalorder %v52_v10, 10 }
  0x10   :  { %108 = vmatpush.msra.mxu1 %v61_v5 }
  0x12   :  { %109 = vmatpush.msra.mxu1 %v60_v7 }
  0x13   :  { %122 = vmatmul.msk.f32.vlgmr.msra.gmra.mxu1 %vm90_vm0, %v49_v8 }
  0x7f   :  { %v55_v11 = vpop.permute.xlu0 %54 }
  0x80   :  { %vm56_vm2 = vcmp.eq.s32.totalorder %v52_v10, %v55_v11 }
  0x81   :  { %vm58_vm4 = vmor %vm56_vm2, %vm57_vm1 }
  0x82   :  { %v59_v13 = vsel %vm58_vm4, 1.0, %v187_v12 }
  0x83   :  { %121 = vmatmul.msk.f32.vlgmr.msra.gmra.mxu0 %vm66_vm3, %v59_v13 }
  0x90   :  { %v111_v14 = vpop.f32.mrf.mxu1 }
 0x100   :  { %v87_v15 = vpop.f32.mrf.mxu0 }
 0x101   :  { %v112_v16 = vadd.f32 %v111_v14, %v87_v15 }
 0x103   :  { %114 = vst [vmem:[%s232_s4] sm:$0xff] %v112_v16 }
 0x104   :  { %119 = vsyncpa [#allocation3], 1 }
 0x105   :  { %120 = vsyncpa [#allocation5], 1 }

</bundles_post_ra>
